<compile_context>
chip_gen: v6e
topology: v6e:2x2x1
jax: 0.10.0
libtpu: 0.0.40
codegen_flags: <defaults>
</compile_context>

<pallas_src>
import functools

import jax
import jax.numpy as jnp
from jax.experimental import pallas as pl
from jax.experimental.pallas import tpu as pltpu

K_IN = 784        # fc1 fan-in (28*28); kept at full extent -> no K padding of x
H = 128
N_OUT = 10
N_PAD = 128       # lane-dense (multiple-of-128) logits width; sliced to 10 outside
TB_MAX = 2048     # tile cap: v7x VMEM headroom (64 MiB physical / 32 MiB scoped)


def _round_up(x, m):
    return (x + m - 1) // m * m


def mlp_kernel(x_ref, w1_ref, b1_ref, w2_ref, b2_ref, w3_ref, b3_ref, o_ref):
    # x arrives f32 straight from HBM; cast to bf16 here (cheap VPU work)
    # instead of a separate wrapper-side pad/cast pass over the whole input.
    x = x_ref[...].astype(jnp.bfloat16)
    # fc1 + relu (bf16 operands on the MXU, f32 accumulation / elementwise)
    h1 = jnp.dot(x, w1_ref[...], preferred_element_type=jnp.float32)
    h1 = jnp.maximum(h1 + b1_ref[...], 0.0)
    # fc2 + relu
    h2 = jnp.dot(h1.astype(jnp.bfloat16), w2_ref[...],
                 preferred_element_type=jnp.float32)
    h2 = jnp.maximum(h2 + b2_ref[...], 0.0)
    # fc3: logits, output dim zero-padded 10 -> 128 for a lane-dense store;
    # stored as bf16 to halve the output write.
    logits = jnp.dot(h2.astype(jnp.bfloat16), w3_ref[...],
                     preferred_element_type=jnp.float32) + b3_ref[...]
    o_ref[...] = logits.astype(o_ref.dtype)


@functools.partial(jax.jit, static_argnames=("tb",))
def mnist_ffnn_forward_padded(x, w1t, b1, w2t, b2, w3t, b3, *, tb=512):
    """x: (B, 784) f32; wNt: (in, out) f32; bN: (1, out) f32.

    Returns padded bf16 logits of shape (b_pad, 128); rows >= B and lanes >= 10
    are padding. Downstream consumers should take this block directly to avoid
    an extra HBM slice pass.
    """
    B = x.shape[0]
    b8 = _round_up(B, 8)
    tb = max(8, min(tb, TB_MAX))
    n_tiles = pl.cdiv(b8, tb)
    # v7x has 2 TensorCores: give the "parallel" batch axis >= 2 tiles whenever
    # the batch allows it (v5e/v6e have a single TC, so this costs nothing there).
    if n_tiles < 2 and b8 >= 16:
        n_tiles = 2
    tb = _round_up(pl.cdiv(b8, n_tiles), 8)   # effective tile, multiple of 8
    b_pad = tb * n_tiles

    # Only the batch dim is padded, and only for ragged batches; K stays at the
    # full 784 extent so the x BlockSpec satisfies the (8,128) rule unpadded.
    if b_pad != B:
        x = jnp.pad(x, ((0, b_pad - B), (0, 0)))

    # Weights are tiny (~0.3 MB in bf16): cast once per call, VMEM-resident in
    # the kernel via constant index_maps (DMA'd a single time).
    w1p = w1t.astype(jnp.bfloat16)
    w2p = w2t.astype(jnp.bfloat16)
    w3p = jnp.pad(w3t, ((0, 0), (0, N_PAD - N_OUT))).astype(jnp.bfloat16)
    b3p = jnp.pad(b3, ((0, 0), (0, N_PAD - N_OUT)))          # biases stay f32

    const = lambda shape: pl.BlockSpec(shape, lambda i: (0, 0))

    weight_elems = K_IN * H + H * H + H * N_PAD
    cost = pl.CostEstimate(
        flops=2 * b_pad * weight_elems,
        transcendentals=0,
        bytes_accessed=(b_pad * K_IN * 4            # x (f32 in)
                        + b_pad * N_PAD * 2         # logits (bf16 out)
                        + weight_elems * 2          # bf16 weights
                        + (H + H + N_PAD) * 4),     # f32 biases
    )

    return pl.pallas_call(
        mlp_kernel,
        out_shape=jax.ShapeDtypeStruct((b_pad, N_PAD), jnp.bfloat16),
        grid=(n_tiles,),
        in_specs=[
            pl.BlockSpec((tb, K_IN), lambda i: (i, 0)),     # x tile (pipelined)
            const((K_IN, H)), const((1, H)),                # fc1
            const((H, H)), const((1, H)),                   # fc2
            const((H, N_PAD)), const((1, N_PAD)),           # fc3
        ],
        out_specs=pl.BlockSpec((tb, N_PAD), lambda i: (i, 0)),
        compiler_params=pltpu.CompilerParams(
            dimension_semantics=("parallel",),
        ),
        cost_estimate=cost,
    )(x, w1p, b1, w2p, b2, w3p, b3p)


def mnist_ffnn_forward(x, w1t, b1, w2t, b2, w3t, b3, *, tb=512):
    """Convenience view returning (B, 10) f32 logits (adds a small slice pass)."""
    out = mnist_ffnn_forward_padded(x, w1t, b1, w2t, b2, w3t, b3, tb=tb)
    return out[: x.shape[0], :N_OUT].astype(jnp.float32)


def init_params(key):
    """Deterministic init mimicking PyTorch nn.Linear default (uniform +/- 1/sqrt(fan_in))."""
    dims = [(784, 128), (128, 128), (128, 10)]
    params = []
    for fan_in, fan_out in dims:
        kw, kb, key = jax.random.split(key, 3)
        bound = 1.0 / jnp.sqrt(fan_in)
        # stored transposed: (in, out), so y = x @ w_t + b matches nn.Linear
        w_t = jax.random.uniform(kw, (fan_in, fan_out), jnp.float32, -bound, bound)
        b = jax.random.uniform(kb, (1, fan_out), jnp.float32, -bound, bound)
        params += [w_t, b]
    return params


def reference_forward(x, w1t, b1, w2t, b2, w3t, b3):
    h1 = jnp.maximum(x @ w1t + b1, 0.0)
    h2 = jnp.maximum(h1 @ w2t + b2, 0.0)
    return h2 @ w3t + b3


if __name__ == "__main__":
    key = jax.random.PRNGKey(0)
    kx, kx2, kp = jax.random.split(key, 3)
    params = init_params(kp)

    # Small multi-tile batch (exercises the >=2-tile "parallel" grid path).
    B = 32
    x = jax.random.normal(kx, (B, 784), jnp.float32)
    out = jax.block_until_ready(mnist_ffnn_forward(x, *params))
    ref = reference_forward(x, *params)
    assert out.shape == (B, 10)
    # bf16 weights/activations/output on the MXU -> relaxed tolerance vs f32 ref
    assert jnp.allclose(out, ref, atol=5e-2, rtol=5e-2), "mismatch vs reference (B=32)"

    # Tiny ragged batch (exercises the batch-padding / single-tile path).
    B2 = 5
    x2 = jax.random.normal(kx2, (B2, 784), jnp.float32)
    out2 = jax.block_until_ready(mnist_ffnn_forward(x2, *params))
    ref2 = reference_forward(x2, *params)
    assert out2.shape == (B2, 10)
    assert jnp.allclose(out2, ref2, atol=5e-2, rtol=5e-2), "mismatch vs reference (B=5)"

    print("KERNEL_OK")
</pallas_src>

<mosaic_0001>
module attributes {stable_mosaic.version = 11 : i64} {
  func.func @mlp_kernel(%arg0: i32, %arg1: memref<16x784xf32, #tpu.memory_space<vmem>>, %arg2: memref<784x128xbf16, #tpu.memory_space<vmem>>, %arg3: memref<1x128xf32, #tpu.memory_space<vmem>>, %arg4: memref<128x128xbf16, #tpu.memory_space<vmem>>, %arg5: memref<1x128xf32, #tpu.memory_space<vmem>>, %arg6: memref<128x128xbf16, #tpu.memory_space<vmem>>, %arg7: memref<1x128xf32, #tpu.memory_space<vmem>>, %arg8: memref<16x128xbf16, #tpu.memory_space<vmem>>) attributes {dimension_semantics = [#tpu.dimension_semantics<parallel>], iteration_bounds = array<i64: 2>, scalar_prefetch = 0 : i64, scratch_operands = 0 : i64, tpu.core_type = #tpu.core_type<tc>, window_params = [{transform_indices = @transform_0, window_bounds = array<i64: 16, 784>}, {pipeline_mode = #tpu.pipeline_mode<synchronous>, transform_indices = @transform_1, window_bounds = array<i64: 784, 128>}, {pipeline_mode = #tpu.pipeline_mode<synchronous>, transform_indices = @transform_2, window_bounds = array<i64: 1, 128>}, {pipeline_mode = #tpu.pipeline_mode<synchronous>, transform_indices = @transform_3, window_bounds = array<i64: 128, 128>}, {pipeline_mode = #tpu.pipeline_mode<synchronous>, transform_indices = @transform_4, window_bounds = array<i64: 1, 128>}, {pipeline_mode = #tpu.pipeline_mode<synchronous>, transform_indices = @transform_5, window_bounds = array<i64: 128, 128>}, {pipeline_mode = #tpu.pipeline_mode<synchronous>, transform_indices = @transform_6, window_bounds = array<i64: 1, 128>}, {transform_indices = @transform_7, window_bounds = array<i64: 16, 128>}]} {
    %c0 = arith.constant 0 : index
    %c0_0 = arith.constant 0 : index
    %0 = vector.load %arg1[%c0, %c0_0] : memref<16x784xf32, #tpu.memory_space<vmem>>, vector<16x784xf32>
    %1 = arith.truncf %0 : vector<16x784xf32> to vector<16x784xbf16>
    %c0_1 = arith.constant 0 : index
    %c0_2 = arith.constant 0 : index
    %2 = vector.load %arg2[%c0_1, %c0_2] : memref<784x128xbf16, #tpu.memory_space<vmem>>, vector<784x128xbf16>
    %cst = arith.constant dense<0.000000e+00> : vector<16x128xf32>
    %3 = tpu.matmul %1, %2, %cst {dimension_numbers = #tpu.dot_dimension_numbers<[1], [0], [0], [1], [0, 0, 1, 1], [], []>} : vector<16x784xbf16>, vector<784x128xbf16>, vector<16x128xf32> -> vector<16x128xf32>
    %c0_3 = arith.constant 0 : index
    %c0_4 = arith.constant 0 : index
    %4 = vector.load %arg3[%c0_3, %c0_4] : memref<1x128xf32, #tpu.memory_space<vmem>>, vector<1x128xf32>
    %5 = vector.broadcast %4 : vector<1x128xf32> to vector<16x128xf32>
    %6 = arith.addf %3, %5 : vector<16x128xf32>
    %cst_5 = arith.constant 0.000000e+00 : f32
    %7 = vector.broadcast %cst_5 : f32 to vector<16x128xf32>
    %8 = arith.maximumf %6, %7 : vector<16x128xf32>
    %9 = arith.truncf %8 : vector<16x128xf32> to vector<16x128xbf16>
    %c0_6 = arith.constant 0 : index
    %c0_7 = arith.constant 0 : index
    %10 = vector.load %arg4[%c0_6, %c0_7] : memref<128x128xbf16, #tpu.memory_space<vmem>>, vector<128x128xbf16>
    %cst_8 = arith.constant dense<0.000000e+00> : vector<16x128xf32>
    %11 = tpu.matmul %9, %10, %cst_8 {dimension_numbers = #tpu.dot_dimension_numbers<[1], [0], [0], [1], [0, 0, 1, 1], [], []>} : vector<16x128xbf16>, vector<128x128xbf16>, vector<16x128xf32> -> vector<16x128xf32>
    %c0_9 = arith.constant 0 : index
    %c0_10 = arith.constant 0 : index
    %12 = vector.load %arg5[%c0_9, %c0_10] : memref<1x128xf32, #tpu.memory_space<vmem>>, vector<1x128xf32>
    %13 = vector.broadcast %12 : vector<1x128xf32> to vector<16x128xf32>
    %14 = arith.addf %11, %13 : vector<16x128xf32>
    %cst_11 = arith.constant 0.000000e+00 : f32
    %15 = vector.broadcast %cst_11 : f32 to vector<16x128xf32>
    %16 = arith.maximumf %14, %15 : vector<16x128xf32>
    %17 = arith.truncf %16 : vector<16x128xf32> to vector<16x128xbf16>
    %c0_12 = arith.constant 0 : index
    %c0_13 = arith.constant 0 : index
    %18 = vector.load %arg6[%c0_12, %c0_13] : memref<128x128xbf16, #tpu.memory_space<vmem>>, vector<128x128xbf16>
    %cst_14 = arith.constant dense<0.000000e+00> : vector<16x128xf32>
    %19 = tpu.matmul %17, %18, %cst_14 {dimension_numbers = #tpu.dot_dimension_numbers<[1], [0], [0], [1], [0, 0, 1, 1], [], []>} : vector<16x128xbf16>, vector<128x128xbf16>, vector<16x128xf32> -> vector<16x128xf32>
    %c0_15 = arith.constant 0 : index
    %c0_16 = arith.constant 0 : index
    %20 = vector.load %arg7[%c0_15, %c0_16] : memref<1x128xf32, #tpu.memory_space<vmem>>, vector<1x128xf32>
    %21 = vector.broadcast %20 : vector<1x128xf32> to vector<16x128xf32>
    %22 = arith.addf %19, %21 : vector<16x128xf32>
    %23 = arith.truncf %22 : vector<16x128xf32> to vector<16x128xbf16>
    %c0_17 = arith.constant 0 : index
    %c0_18 = arith.constant 0 : index
    %24 = vector.load %arg8[%c0_17, %c0_18] : memref<16x128xbf16, #tpu.memory_space<vmem>>, vector<16x128xbf16>
    tpu.vector_store %arg8[%c0_17, %c0_18], %23 {strides = array<i32>} : memref<16x128xbf16, #tpu.memory_space<vmem>>, vector<16x128xbf16>,
    return
  }
  func.func @transform_0(%arg0: i32) -> (i32, i32) {
    %c0_i32 = arith.constant 0 : i32
    %c0_i32_0 = arith.constant 0 : i32
    return %arg0, %c0_i32 : i32, i32
  }
  func.func @transform_1(%arg0: i32) -> (i32, i32) {
    %c0_i32 = arith.constant 0 : i32
    %c0_i32_0 = arith.constant 0 : i32
    %c0_i32_1 = arith.constant 0 : i32
    return %c0_i32, %c0_i32_0 : i32, i32
  }
  func.func @transform_2(%arg0: i32) -> (i32, i32) {
    %c0_i32 = arith.constant 0 : i32
    %c0_i32_0 = arith.constant 0 : i32
    %c0_i32_1 = arith.constant 0 : i32
    return %c0_i32, %c0_i32_0 : i32, i32
  }
  func.func @transform_3(%arg0: i32) -> (i32, i32) {
    %c0_i32 = arith.constant 0 : i32
    %c0_i32_0 = arith.constant 0 : i32
    %c0_i32_1 = arith.constant 0 : i32
    return %c0_i32, %c0_i32_0 : i32, i32
  }
  func.func @transform_4(%arg0: i32) -> (i32, i32) {
    %c0_i32 = arith.constant 0 : i32
    %c0_i32_0 = arith.constant 0 : i32
    %c0_i32_1 = arith.constant 0 : i32
    return %c0_i32, %c0_i32_0 : i32, i32
  }
  func.func @transform_5(%arg0: i32) -> (i32, i32) {
    %c0_i32 = arith.constant 0 : i32
    %c0_i32_0 = arith.constant 0 : i32
    %c0_i32_1 = arith.constant 0 : i32
    return %c0_i32, %c0_i32_0 : i32, i32
  }
  func.func @transform_6(%arg0: i32) -> (i32, i32) {
    %c0_i32 = arith.constant 0 : i32
    %c0_i32_0 = arith.constant 0 : i32
    %c0_i32_1 = arith.constant 0 : i32
    return %c0_i32, %c0_i32_0 : i32, i32
  }
  func.func @transform_7(%arg0: i32) -> (i32, i32) {
    %c0_i32 = arith.constant 0 : i32
    %c0_i32_0 = arith.constant 0 : i32
    return %arg0, %c0_i32 : i32, i32
  }
}

</mosaic_0001>

<bundles_post_ra>
// kernel: mnist_ffnn_forward_padded.1
= control target key start
LH: loop header
LB: loop body
LE: loop exit
PB: predicated region body
PF: predicated region fallthrough
CT: control target
= control target key end

     0   :  { %12 = vsyncpa [#allocation3], 0  ;;  %s1971_s0 = inlined_call_operand.vmem [shape: f32[32,784], index: 0, kind: input, shape index: {}]   ;;  %s1972_s1 = inlined_call_operand.vmem [shape: bf16[784,128], index: 1, kind: input, shape index: {}]   ;;  %s1973_s2 = inlined_call_operand.vmem [shape: f32[1,128], index: 2, kind: input, shape index: {}]   ;;  %s1974_s3 = inlined_call_operand.vmem [shape: bf16[128,128], index: 3, kind: input, shape index: {}]   ;;  %s1975_s4 = inlined_call_operand.vmem [shape: f32[1,128], index: 4, kind: input, shape index: {}]   ;;  %s1976_s5 = inlined_call_operand.vmem [shape: bf16[128,128], index: 5, kind: input, shape index: {}]   ;;  %s1977_s6 = inlined_call_operand.vmem [shape: f32[1,128], index: 6, kind: input, shape index: {}]   ;;  %s1978_s7 = inlined_call_operand.hbm [shape: bf16[32,128], index: 7, kind: output, shape index: {}]  }
   0x1   :  { %14 = vsyncpa [#allocation3 + $0x1], 0  ;;  %s1627_s24 = smov 0   ;;  %s1629_s25 = smov 0  }
   0x2   :  { %s1631_s26 = smov 0   ;;  %s1633_s27 = smov 0  }
   0x3 LB: > { %s1648_s28 = sadd.s32 4294967295, %s1580_s27   ;;  %s1188_s29 = sadd.s32 4294967294, %s1580_s27   ;;  %s1580_s27 = sphi %s1633_s27, %s1984_s27   ;;  %s1576_s26 = sphi %s1631_s26, %s1983_s26   ;;  %s1572_s25 = sphi %s1629_s25, %s1982_s25   ;;  %s1568_s24 = sphi %s1627_s24, %s1981_s24  }
   0x4   : > { %s1652_s30 = sadd.s32 1, %s1580_s27   ;;  %s179_s8 = sadd.s32 1, %s1576_s26 }
   0x5   : > { %s176_s9 = ssub.s32 %s1580_s27, %s1652_s30  ;;  %p189_p0 = scmp.ne.s32.totalorder %s1576_s26, %s1572_s25 }
   0x6   : > { %p177_p1 = scmp.eq.s32.totalorder %s176_s9, 0  ;;  %p190_p2 = scmp.eq.s32.totalorder %s1648_s28, 1 }
   0x7   : > { %p195_p3 = scmp.ne.s32.totalorder %s1572_s25, %s1568_s24  ;;  %p196_p4 = scmp.eq.s32.totalorder %s1188_s29, 1 }
   0x8   : > { %s1663_s10 = scalar_select %p177_p1, %s1576_s26, %s179_s8  }
   0x9   : > { %p1665_p5 = por %p190_p2, %p189_p0  ;;  %p1669_p6 = por %p196_p4, %p195_p3 }
   0xa   : > { %p1191_p7 = scmp.ge.s32.totalorder %s1580_s27, 1  ;;  %p242_p8 = scmp.lt.s32.totalorder %s1580_s27, 3 }
   0xc   : > { %p243_p9 = pnand %p1191_p7, %p242_p8 }
   0xd   : > { %s1193_s13 = sshll.u32 (!%p243_p9), %s1648_s28, 1  ;;  %s272_s16 = sand.u32 (!%p243_p9), 1, %s1572_s25  }
   0xe   : > { %246 = sbr.rel (%p243_p9) target bundleno = 711 (0x2c7), region = 48  ;;  %p276_p10 = scmp.lt.s32.totalorder (!%p243_p9), %s1193_s13, 3 }
   0xf   : > { %s1192_s17 = sshll.u32 (!%p243_p9), %s272_s16, 3  ;;  %s1273_s22 = sshll.u32 (!%p243_p9), %s1648_s28, 7 }
  0x10   : > { %s274_s19 = scalar_lea.vmem (!%p243_p9), [#allocation2], %s1192_s17  ;;  %s1584_s28 = smov (!%p243_p9), [#allocation2]  }
  0x11   : > { %s1126_s21 = sshll.u32 (!%p243_p9), %s274_s19, 4  ;;  %s1524_s14 = sshll.u32 (!%p243_p9), %s1584_s28, 4  ;;  %s1924_s21 = int_to_ptr.vmem [resolvable:$true] %s1126_s21  ;;  %s1525_s14 = int_to_ptr.vmem [resolvable:$false] %s1524_s14 }
  0x12   : > { %s1520_s9 = scalar_lea.vmem (!%p243_p9), %s1924_s21, 128  ;;  %s1526_s15 = scalar_lea.vmem (!%p243_p9), %s1525_s14, 256 }
  0x13   : > { %v1455_v0 = vld [vmem:[%s1972_s1 + $0x78] sm:$0xff]   ;;  %v1459_v4 = vld [vmem:[%s1972_s1 + $0x70] sm:$0xff]   ;;  %v1463_v8 = vld [vmem:[%s1972_s1 + $0x68] sm:$0xff]   ;;  %s1986_s13 = smov (!%p276_p10, %s1193_s13), 3  ;;  %v1582_v43 = vmov 0.0   ;;  %vm1583_vm0 = vmmov 0   ;;  %p1521_p11 = scmp.ne.s32.totalorder %s1924_s21, %s1520_s9 }
  0x14   : > { %v1456_v1 = vld [vmem:[%s1972_s1 + $0x38] sm:$0xff]   ;;  %1279 = vmatprep.subr.bf16.mxu0 %v1455_v0  ;;  %v1460_v5 = vld [vmem:[%s1972_s1 + $0x30] sm:$0xff]   ;;  %v1464_v9 = vld [vmem:[%s1972_s1 + $0x28] sm:$0xff]   ;;  %s1411_s23 = smul.u32 56, %s1986_s13  ;;  %vm704_vm1 = vcmask 130048   ;;  %p1527_p0 = scmp.lt.s32.totalorder %s1924_s21, %s1525_s14 }
  0x15   : > { %v1457_v2 = vld [vmem:[%s1972_s1 + $0xf8] sm:$0xff]   ;;  %1280 = vmatpush3.bf16.msra.mxu0 %v1456_v1  ;;  %v1461_v6 = vld [vmem:[%s1972_s1 + $0xf0] sm:$0xff]   ;;  %v1465_v10 = vld [vmem:[%s1972_s1 + $0xe8] sm:$0xff]   ;;  %p1522_p12 = pnand %p1521_p11, %p1665_p5  ;;  %p1528_p1 = scmp.lt.s32.totalorder %s1526_s15, %s1520_s9 }
  0x16   : > { %v1458_v3 = vld [vmem:[%s1972_s1 + $0xb8] sm:$0xff]   ;;  %1301 = vmatprep.subr.bf16.mxu1 %v1457_v2  ;;  %1281 = vmatprep.subr.bf16.mxu0 %v1459_v4  ;;  %v1462_v7 = vld [vmem:[%s1972_s1 + $0xb0] sm:$0xff]   ;;  %v1466_v11 = vld [vmem:[%s1972_s1 + $0xa8] sm:$0xff]   ;;  %s1766_s20 = scalar_lea.vmem %s1971_s0, %s1411_s23  ;;  %s1929_s23 = scalar_lea.hbm %s1978_s7, %s1273_s22 }
  0x17   : > { %1302 = vmatpush3.bf16.msra.mxu1 %v1458_v3  ;;  %v1467_v12 = vld [vmem:[%s1972_s1 + $0x60] sm:$0xff]   ;;  %v1471_v16 = vld [vmem:[%s1972_s1 + $0x58] sm:$0xff]   ;;  %v1475_v20 = vld [vmem:[%s1972_s1 + $0x50] sm:$0xff]   ;;  %p1523_p13 = pneg %p1522_p12  ;;  %p1529_p2 = por %p1528_p1, %p1527_p0 }
  0x18   : > { %1303 = vmatprep.subr.bf16.mxu1 %v1461_v6  ;;  %v1468_v13 = vld [vmem:[%s1972_s1 + $0x20] sm:$0xff]   ;;  %v1472_v17 = vld [vmem:[%s1972_s1 + $0x18] sm:$0xff]   ;;  %v1476_v21 = vld [vmem:[%s1972_s1 + $0x10] sm:$0xff]  }
  0x19   : > { %1282 = vmatpush3.bf16.msra.mxu0 %v1460_v5  ;;  %v1469_v14 = vld [vmem:[%s1972_s1 + $0xe0] sm:$0xff]   ;;  %v1473_v18 = vld [vmem:[%s1972_s1 + $0xd8] sm:$0xff]   ;;  %v1477_v22 = vld [vmem:[%s1972_s1 + $0xd0] sm:$0xff]   ;;  %p1530_p3 = pnand %p1529_p2, %p1523_p13 }
  0x1a   : > { %1283 = vmatprep.subr.bf16.mxu0 %v1463_v8  ;;  %v1470_v15 = vld [vmem:[%s1972_s1 + $0xa0] sm:$0xff]   ;;  %v1474_v19 = vld [vmem:[%s1972_s1 + $0x98] sm:$0xff]   ;;  %v1478_v23 = vld [vmem:[%s1972_s1 + $0x90] sm:$0xff]  }
  0x1b   : > { %1304 = vmatpush3.bf16.msra.mxu1 %v1462_v7  ;;  %v1479_v24 = vld [vmem:[%s1972_s1 + $0x48] sm:$0xff]   ;;  %v1483_v28 = vld [vmem:[%s1972_s1 + $0x40] sm:$0xff]   ;;  %v291_v36 = vld [vmem:[%s1766_s20 + $0x38] sm:$0xff] }
  0x1c   : > { %1305 = vmatprep.subr.bf16.mxu1 %v1465_v10  ;;  %v1480_v25 = vld [vmem:[%s1972_s1 + $0x8] sm:$0xff]   ;;  %v1484_v29 = vld [vmem:[%s1972_s1] sm:$0xff]   ;;  %v1487_v38 = vld [vmem:[%s1972_s1 + $0x178] sm:$0xff]  }
  0x1d   : > { %1284 = vmatpush3.bf16.msra.mxu0 %v1464_v9  ;;  %v1481_v26 = vld [vmem:[%s1972_s1 + $0xc8] sm:$0xff]   ;;  %v1485_v30 = vld [vmem:[%s1972_s1 + $0xc0] sm:$0xff]   ;;  %v287_v39 = vld [vmem:[%s1766_s20 + $0x18] sm:$0xff] }
  0x1e   : > { %1285 = vmatprep.subr.bf16.mxu0 %v1467_v12  ;;  %v1482_v27 = vld [vmem:[%s1972_s1 + $0x88] sm:$0xff]   ;;  %v292_v32 = vld [vmem:[%s1766_s20 + $0x40] sm:$0xff]  ;;  %v294_v40 = vld [vmem:[%s1766_s20 + $0x50] sm:$0xff] }
  0x1f   : > { %1306 = vmatpush3.bf16.msra.mxu1 %v1466_v11  ;;  %v285_v31 = vld [vmem:[%s1766_s20 + $0x8] sm:$0xff]  ;;  %v1486_v34 = vld [vmem:[%s1972_s1 + $0x80] sm:$0xff]   ;;  %v301_v41 = vpack.c.bf16 %v294_v40, %v287_v39  ;;  %v1488_v42 = vld [vmem:[%s1972_s1 + $0x138] sm:$0xff]  }
  0x20   : > { %1307 = vmatprep.subr.bf16.mxu1 %v1469_v14  ;;  %v299_v33 = vpack.c.bf16 %v292_v32, %v285_v31  ;;  %v284_v35 = vld [vmem:[%s1766_s20] sm:$0xff]  ;;  %v286_v44 = vld [vmem:[%s1766_s20 + $0x10] sm:$0xff]  ;;  %v293_v45 = vld [vmem:[%s1766_s20 + $0x48] sm:$0xff] }
  0x21   : > { %1286 = vmatpush3.bf16.msra.mxu0 %v1468_v13  ;;  %v298_v37 = vpack.c.bf16 %v291_v36, %v284_v35  ;;  %781 = vmatprep.mubr.bf16.mxu1 %v301_v41  ;;  %v300_v46 = vpack.c.bf16 %v293_v45, %v286_v44  ;;  %v1489_v47 = vld [vmem:[%s1972_s1 + $0x170] sm:$0xff]   ;;  %v1491_v49 = vld [vmem:[%s1972_s1 + $0x168] sm:$0xff]   ;;  %v1493_v51 = vld [vmem:[%s1972_s1 + $0x160] sm:$0xff]  }
  0x22   : > { %1287 = vmatprep.subr.bf16.mxu0 %v1471_v16  ;;  %740 = vmatprep.mubr.bf16.mxu0 %v299_v33  ;;  %v1490_v48 = vld [vmem:[%s1972_s1 + $0x130] sm:$0xff]   ;;  %v1492_v50 = vld [vmem:[%s1972_s1 + $0x128] sm:$0xff]   ;;  %v1494_v52 = vld [vmem:[%s1972_s1 + $0x120] sm:$0xff]  }
  0x23   : > { %1308 = vmatpush3.bf16.msra.mxu1 %v1470_v15  ;;  %v1495_v53 = vld [vmem:[%s1972_s1 + $0x158] sm:$0xff]   ;;  %v1497_v55 = vld [vmem:[%s1972_s1 + $0x150] sm:$0xff]   ;;  %v1503_v56 = vld [vmem:[%s1972_s1 + $0x180] sm:$0xff]  }
  0x24   : > { %1309 = vmatprep.subr.bf16.mxu1 %v1473_v18  ;;  %v1496_v54 = vld [vmem:[%s1972_s1 + $0x118] sm:$0xff]   ;;  %v289_v57 = vld [vmem:[%s1766_s20 + $0x28] sm:$0xff]  ;;  %v1498_v58 = vld [vmem:[%s1972_s1 + $0x110] sm:$0xff]  }
  0x25   : > { %1288 = vmatpush3.bf16.msra.mxu0 %v1472_v17  ;;  %v1499_v59 = vld [vmem:[%s1972_s1 + $0x148] sm:$0xff]   ;;  %v296_v60 = vld [vmem:[%s1766_s20 + $0x60] sm:$0xff]  ;;  %v290_v62 = vld [vmem:[%s1766_s20 + $0x30] sm:$0xff] }
  0x26   : > { %1289 = vmatprep.subr.bf16.mxu0 %v1475_v20  ;;  %v303_v61 = vpack.c.bf16 %v296_v60, %v289_v57  ;;  %v297_v63 = vld [vmem:[%s1766_s20 + $0x68] sm:$0xff]  ;;  %v1501_v2 = vld [vmem:[%s1972_s1 + $0x140] sm:$0xff]   ;;  %v295_v5 = vld [vmem:[%s1766_s20 + $0x58] sm:$0xff] }
  0x27   : > { %1310 = vmatpush3.bf16.msra.mxu1 %v1474_v19  ;;  %v304_v0 = vpack.c.bf16 %v297_v63, %v290_v62  ;;  %v1500_v1 = vld [vmem:[%s1972_s1 + $0x108] sm:$0xff]   ;;  %v1502_v3 = vld [vmem:[%s1972_s1 + $0x100] sm:$0xff]   ;;  %v1504_v7 = vld [vmem:[%s1974_s3 + $0x38] sm:$0xff]  }
  0x28   : > { %1311 = vmatprep.subr.bf16.mxu1 %v1477_v22  ;;  %v288_v4 = vld [vmem:[%s1766_s20 + $0x20] sm:$0xff]  ;;  %v1505_v8 = vld [vmem:[%s1974_s3 + $0x30] sm:$0xff]   ;;  %v1506_v9 = vld [vmem:[%s1974_s3 + $0x28] sm:$0xff]   ;;  %s1931_s20 = scalar_lea.sflag [#allocation3], %s272_s16 }
  0x29   : > { %1290 = vmatpush3.bf16.msra.mxu0 %v1476_v21  ;;  %v302_v6 = vpack.c.bf16 %v295_v5, %v288_v4  ;;  %v1507_v10 = vld [vmem:[%s1974_s3 + $0x20] sm:$0xff]   ;;  %v1508_v11 = vld [vmem:[%s1974_s3 + $0x18] sm:$0xff]   ;;  %v1509_v12 = vld [vmem:[%s1974_s3 + $0x10] sm:$0xff]  }
  0x2a   : > { %1291 = vmatprep.subr.bf16.mxu0 %v1479_v24  ;;  %v1510_v13 = vld [vmem:[%s1974_s3 + $0x8] sm:$0xff]   ;;  %v1511_v14 = vld [vmem:[%s1974_s3] sm:$0xff]   ;;  %v1512_v15 = vld [vmem:[%s1976_s5 + $0x38] sm:$0xff]  }
  0x2b   : > { %1312 = vmatpush3.bf16.msra.mxu1 %v1478_v23  ;;  %v1513_v16 = vld [vmem:[%s1976_s5 + $0x30] sm:$0xff]   ;;  %v1514_v17 = vld [vmem:[%s1976_s5 + $0x28] sm:$0xff]   ;;  %v1515_v18 = vld [vmem:[%s1976_s5 + $0x20] sm:$0xff]  }
  0x2c   : > { %1313 = vmatprep.subr.bf16.mxu1 %v1481_v26  ;;  %v1516_v19 = vld [vmem:[%s1976_s5 + $0x18] sm:$0xff]   ;;  %v1195_v32 = vld [vmem:[%s1973_s2] ss:$0 sm:$0xff] }
  0x2d   : > { %1292 = vmatpush3.bf16.msra.mxu0 %v1480_v25  ;;  %v1519_v57 = vld [vmem:[%s1976_s5] sm:$0xff]  }
  0x2e   : > { %1293 = vmatprep.subr.bf16.mxu0 %v1483_v28  ;;  %v1255_v4 = vld [vmem:[%s1977_s6] ss:$0 sm:$0xff] }
  0x2f   : > { %1314 = vmatpush3.bf16.msra.mxu1 %v1482_v27 }
  0x30   : > { %1315 = vmatprep.subr.bf16.mxu1 %v1485_v30 }
  0x31   : > { %1294 = vmatpush3.bf16.msra.mxu0 %v1484_v29 }
  0x32   : > { %1323 = vmatprep.subr.bf16.mxu0 %v1487_v38 }
  0x33   : > { %1316 = vmatpush3.bf16.msra.mxu1 %v1486_v34 }
  0x34   : > { %1365 = vmatprep.subr.bf16.mxu1 %v1582_v43  ;;  %741 = vmatmul.mubr.bf16.vlgmr.msra.gmra.mxu0 %v298_v37 }
  0x35   : > { %1324 = vmatpush3.bf16.msra.mxu0 %v1488_v42  ;;  %822 = vmatprep.mubr.bf16.mxu0 %v303_v61 }
  0x36   : > { %782 = vmatmul.mubr.bf16.vlgmr.msra.gmra.mxu1 %v300_v46  ;;  %1325 = vmatprep.subr.bf16.mxu0 %v1489_v47 }
  0x37   : > { %1367 = vmatprep.mubr.msk.bf16.mxu1 %vm1583_vm0, %v1582_v43  ;;  %1366 = vmatpush3.bf16.msra.mxu1 %v1503_v56  ;;  %v1518_v56 = vld [vmem:[%s1976_s5 + $0x8] sm:$0xff]  }
  0x38   : > { %1371 = vmatprep.subr.bf16.mxu1 %v1582_v43 }
  0x39   : > { %1326 = vmatpush3.bf16.msra.mxu0 %v1490_v48 }
  0x3a   : > { %1327 = vmatprep.subr.bf16.mxu0 %v1491_v49 }
  0x3d   : > { %1328 = vmatpush3.bf16.msra.mxu0 %v1492_v50 }
  0x3e   : > { %1329 = vmatprep.subr.bf16.mxu0 %v1493_v51  ;;  %1368 = vmatmul.mubr.msk.bf16.vlgmr.msra.gmra.mxu1 %vm704_vm1, %v304_v0 }
  0x3f   : > { %1387 = vmatprep.mubr.msk.bf16.mxu1 %vm1583_vm0, %v1582_v43  ;;  %1372 = vmatpush3.bf16.msra.mxu1 %v1504_v7 }
  0x40   : > { %1373 = vmatprep.subr.bf16.mxu1 %v1582_v43 }
  0x41   : > { %1330 = vmatpush3.bf16.msra.mxu0 %v1494_v52 }
  0x42   : > { %1331 = vmatprep.subr.bf16.mxu0 %v1495_v53 }
  0x43   : > { %1374 = vmatpush3.bf16.msra.mxu1 %v1505_v8 }
  0x44   : > { %1375 = vmatprep.subr.bf16.mxu1 %v1582_v43 }
  0x45   : > { %1332 = vmatpush3.bf16.msra.mxu0 %v1496_v54 }
  0x46   : > { %1333 = vmatprep.subr.bf16.mxu0 %v1497_v55  ;;  %v1517_v55 = vld [vmem:[%s1976_s5 + $0x10] sm:$0xff]  }
  0x47   : > { %1376 = vmatpush3.bf16.msra.mxu1 %v1506_v9 }
  0x48   : > { %1377 = vmatprep.subr.bf16.mxu1 %v1582_v43 }
  0x49   : > { %1334 = vmatpush3.bf16.msra.mxu0 %v1498_v58  ;;  %v1246_v58 = vld [vmem:[%s1975_s4] ss:$0 sm:$0xff] }
  0x4a   : > { %1335 = vmatprep.subr.bf16.mxu0 %v1499_v59 }
  0x4b   : > { %1378 = vmatpush3.bf16.msra.mxu1 %v1507_v10 }
  0x4c   : > { %1379 = vmatprep.subr.bf16.mxu1 %v1582_v43 }
  0x4d   : > { %1336 = vmatpush3.bf16.msra.mxu0 %v1500_v1 }
  0x4e   : > { %1337 = vmatprep.subr.bf16.mxu0 %v1501_v2 }
  0x4f   : > { %1380 = vmatpush3.bf16.msra.mxu1 %v1508_v11 }
  0x50   : > { %1381 = vmatprep.subr.bf16.mxu1 %v1582_v43 }
  0x51   : > { %1338 = vmatpush3.bf16.msra.mxu0 %v1502_v3 }
  0x52   : > { %1391 = vmatprep.subr.bf16.mxu0 %v1582_v43 }
  0x53   : > { %1382 = vmatpush3.bf16.msra.mxu1 %v1509_v12 }
  0x54   : > { %823 = vmatmul.mubr.bf16.vlgmr.msra.gmra.mxu0 %v302_v6  ;;  %1383 = vmatprep.subr.bf16.mxu1 %v1582_v43 }
  0x55   : > { %1407 = vmatprep.mubr.msk.bf16.mxu0 %vm1583_vm0, %v1582_v43  ;;  %1392 = vmatpush3.bf16.msra.mxu0 %v1512_v15 }
  0x56   : > { %1393 = vmatprep.subr.bf16.mxu0 %v1582_v43 }
  0x57   : > { %1384 = vmatpush3.bf16.msra.mxu1 %v1510_v13 }
  0x58   : > { %1385 = vmatprep.subr.bf16.mxu1 %v1582_v43 }
  0x59   : > { %1394 = vmatpush3.bf16.msra.mxu0 %v1513_v16 }
  0x5a   : > { %1395 = vmatprep.subr.bf16.mxu0 %v1582_v43 }
  0x5b   : > { %1386 = vmatpush3.bf16.msra.mxu1 %v1511_v14 }
  0x5d   : > { %1396 = vmatpush3.bf16.msra.mxu0 %v1514_v17 }
  0x5e   : > { %1397 = vmatprep.subr.bf16.mxu0 %v1582_v43 }
  0x61   : > { %1398 = vmatpush3.bf16.msra.mxu0 %v1515_v18 }
  0x62   : > { %1399 = vmatprep.subr.bf16.mxu0 %v1582_v43 }
  0x65   : > { %1400 = vmatpush3.bf16.msra.mxu0 %v1516_v19 }
  0x66   : > { %1401 = vmatprep.subr.bf16.mxu0 %v1582_v43 }
  0x69   : > { %1402 = vmatpush3.bf16.msra.mxu0 %v1517_v55 }
  0x6a   : > { %1403 = vmatprep.subr.bf16.mxu0 %v1582_v43 }
  0x6d   : > { %1404 = vmatpush3.bf16.msra.mxu0 %v1518_v56 }
  0x6e   : > { %1405 = vmatprep.subr.bf16.mxu0 %v1582_v43 }
  0x71   : > { %1406 = vmatpush3.bf16.msra.mxu0 %v1519_v57 }
  0xf4   : > { %v1295_v23 = vpop.f32.mrf.mxu0 }
  0xf6   : > { %v1317_v20 = vpop.f32.mrf.mxu1  ;;  %v1296_v25 = vpop.f32.mrf.mxu0 }
  0xf7   : > { %v1297_v31 = vadd.f32 %v1296_v25, %v1295_v23 }
  0xf8   : > { %v1318_v21 = vpop.f32.mrf.mxu1  ;;  %v1298_v28 = vpop.f32.mrf.mxu0 }
  0xf9   : > { %v743_v34 = vadd.f32 %v1297_v31, %v1195_v32  ;;  %v1319_v35 = vadd.f32 %v1318_v21, %v1317_v20 }
  0xfa   : > { %v1320_v22 = vpop.f32.mrf.mxu1  ;;  %v1299_v33 = vpop.f32.mrf.mxu0 }
  0xfb   : > { %v1300_v36 = vadd.f32 %v1299_v33, %v1298_v28  ;;  %v784_v39 = vadd.f32 %v1319_v35, %v743_v34 }
  0xfc   : > { %v1321_v24 = vpop.f32.mrf.mxu1 }
  0xfd   : > { %v746_v40 = vadd.f32 %v1300_v36, %v1195_v32  ;;  %v1322_v41 = vadd.f32 %v1321_v24, %v1320_v22 }
  0xfe   : > { %v865_v26 = vpop.f32.mrf.mxu1 }
  0xff   : > { %v787_v47 = vadd.f32 %v1322_v41, %v746_v40 }
 0x100   : > { %v1369_v27 = vpop.f32.mrf.mxu1 }
 0x102   : > { %v868_v29 = vpop.f32.mrf.mxu1 }
 0x104   : > { %v1370_v30 = vpop.f32.mrf.mxu1 }
 0x114   : > { %v1339_v37 = vpop.f32.mrf.mxu0 }
 0x116   : > { %v1340_v38 = vpop.f32.mrf.mxu0 }
 0x117   : > { %v1341_v42 = vadd.f32 %v1340_v38, %v1339_v37 }
 0x118   : > { %v1342_v44 = vpop.f32.mrf.mxu0 }
 0x119   : > { %v825_v45 = vadd.f32 %v1341_v42, %v784_v39 }
 0x11a   : > { %v1343_v46 = vpop.f32.mrf.mxu0 }
 0x11b   : > { %v1344_v48 = vadd.f32 %v1343_v46, %v1342_v44  ;;  %v866_v49 = vadd.f32 %v865_v26, %v825_v45 }
 0x11d   : > { %v828_v50 = vadd.f32 %v1344_v48, %v787_v47  ;;  %v872_v52 = vmax.f32 %v866_v49, 0.0 }
 0x11f   : > { %v869_v51 = vadd.f32 %v868_v29, %v828_v50 }
 0x121   : > { %v873_v53 = vmax.f32 %v869_v51, 0.0 }
 0x123   : > { %v874_v54 = vpack.c.bf16 %v873_v53, %v872_v52 }
 0x125   : > { %1388 = vmatmul.mubr.bf16.vlgmr.msra.gmra.mxu1 %v874_v54 }
 0x1e5   : > { %v980_v59 = vpop.f32.mrf.mxu1 }
 0x1e6   : > { %v981_v61 = vadd.f32 %v1246_v58, %v980_v59 }
 0x1e7   : > { %v1389_v60 = vpop.f32.mrf.mxu1 }
 0x1e8   : > { %v987_v1 = vmax.f32 %v981_v61, 0.0 }
 0x1e9   : > { %v983_v62 = vpop.f32.mrf.mxu1 }
 0x1ea   : > { %v984_v63 = vadd.f32 %v1246_v58, %v983_v62 }
 0x1eb   : > { %v1390_v0 = vpop.f32.mrf.mxu1 }
 0x1ec   : > { %v988_v2 = vmax.f32 %v984_v63, 0.0 }
 0x1ee   : > { %v989_v3 = vpack.c.bf16 %v988_v2, %v987_v1 }
 0x1f0   : > { %1408 = vmatmul.mubr.bf16.vlgmr.msra.gmra.mxu0 %v989_v3 }
 0x2b0   : > { %v1095_v43 = vpop.f32.mrf.mxu0 }
 0x2b1   : > { %v1096_v7 = vadd.f32 %v1255_v4, %v1095_v43 }
 0x2b2   : > { %v1409_v5 = vpop.f32.mrf.mxu0 }
 0x2b4   : > { %v1098_v6 = vpop.f32.mrf.mxu0 }
 0x2b5   : > { %v1099_v8 = vadd.f32 %v1255_v4, %v1098_v6 }
 0x2b6   : > { %v1410_v9 = vpop.f32.mrf.mxu0 }
 0x2b7   : > { %v1277_v10 = vpack.c.bf16 %v1099_v8, %v1096_v7 }
 0x2b9   : > { %1278 = vst [vmem:[%s274_s19] sm:$0xff] %v1277_v10  }
 0x2ba   : > { %1533 = shalt.err (!%p1530_p3)
}
 0x2bb   : > { %s1534_s16 = scalar_lea.hbm %s1929_s23, 128  ;;  %s1538_s13 = scalar_lea.hbm %s1978_s7, 256 }
 0x2bc   : > { %p1535_p4 = scmp.ne.s32.totalorder %s1929_s23, %s1534_s16  ;;  %p1539_p9 = scmp.lt.s32.totalorder %s1929_s23, %s1978_s7 }
 0x2bd   : > { %p1540_p10 = scmp.lt.s32.totalorder %s1538_s13, %s1534_s16 }
 0x2be   : > { %p1536_p7 = pnand %p1535_p4, %p1665_p5 }
 0x2bf   : > { %p1541_p11 = por %p1540_p10, %p1539_p9 }
 0x2c0   : > { %p1537_p8 = pneg %p1536_p7 }
 0x2c2   : > { %p1542_p12 = pnand %p1541_p11, %p1537_p8 }
 0x2c4   : > { %1545 = shalt.err (!%p1542_p12)
}
 0x2c5   : > { %s1585_s29 = smov 64   ;;  %s1586_s8 = smov 4  }
 0x2c6   : > { %1412 = dma.vmem_to_hbm [thread:$0]  (%p1665_p5), %s1924_s21, 128, %s1929_s23, %s1931_s20, %s1585_s29, %s1585_s29, %s1586_s8  }
 0x2c7 PF: > { %p1418_p13 = scmp.ge.s32.totalorder %s1580_s27, 2  ;;  %s1141_s9 = sand.u32 1, %s1568_s24  }
 0x2c8   : > { %s1142_s28 = scalar_lea.sflag [#allocation3], %s1141_s9 }
 0x2c9   : > { %p1415_p0 = pnand %p1418_p13, %p1669_p6 }
 0x2cb   : > { %p1416_p1 = pneg %p1415_p0 }
 0x2cd   : > { %1563 = dma.done.wait (%p1416_p1), %s1142_s28, 128  }
 0x2ce   : > { %1565 = vsyncadd (%p1416_p1), %s1142_s28, 4294967168  ;;  %p17_p2 = scmp.ge.s32.totalorder %s1652_s30, 4   ;;  %s1981_s24 = smov %s1572_s25 }
 0x2cf   : > { %s1982_s25 = smov %s1576_s26  ;;  %s1983_s26 = smov %s1663_s10 }
 0x2d0   : > { %s1984_s27 = smov %s1652_s30  ;;  %19 = sbr.rel (!%p17_p2) target bundleno = 3 (0x3), region = 83 }
 0x2d5   :  { %1147 = vsyncpa [#allocation3], 1 }
 0x2d6   :  { %1149 = vsyncpa [#allocation3 + $0x1], 1 }

</bundles_post_ra>
